<compile_context>
chip_gen: v5e
topology: v5e:2x2
jax: 0.10.0
libtpu: 0.0.40
codegen_flags: <defaults>
</compile_context>

<pallas_src>
import jax
import jax.numpy as jnp
from jax.experimental import pallas as pl
from jax.experimental.pallas import tpu as pltpu

LANE = 128
SUBLANE = 8


def _round_up(n, m):
    return ((n + m - 1) // m) * m


def _pad2d(a, rows, cols):
    return jnp.pad(a, ((0, rows - a.shape[0]), (0, cols - a.shape[1])))


def mlp_kernel(x_ref, w1_ref, b1_ref, w2_ref, b2_ref, w3_ref, b3_ref, o_ref):
    # Layer 1: bf16 MXU matmul, f32 accumulate; bias + ReLU in f32 (VPU).
    h = jnp.dot(x_ref[...], w1_ref[...], preferred_element_type=jnp.float32)
    h = jnp.maximum(h + b1_ref[...], 0.0)
    # Layer 2
    h = jnp.dot(h.astype(w2_ref.dtype), w2_ref[...],
                preferred_element_type=jnp.float32)
    h = jnp.maximum(h + b2_ref[...], 0.0)
    # Layer 3 (no activation, matches the PyTorch forward)
    out = jnp.dot(h.astype(w3_ref.dtype), w3_ref[...],
                  preferred_element_type=jnp.float32)
    o_ref[...] = (out + b3_ref[...]).astype(o_ref.dtype)


def _preferred_tm():
    """Batch-tile rows: 128 on v5e (4x 128x128 MXU), 256 on v6e/v7x (2x 256x256)."""
    try:
        kind = jax.devices()[0].device_kind.lower()
    except Exception:
        kind = ""
    return 128 if "v5" in kind else 256


def mlp_forward(x, w1, b1, w2, b2, w3, b3, *, compute_dtype=jnp.bfloat16):
    batch, input_size = x.shape
    hidden = w1.shape[1]
    num_classes = w3.shape[1]

    # Lane-pad every feature dim to a multiple of 128 (zero padding is inert:
    # padded hidden columns give relu(0+0)=0, padded output columns are
    # sliced off below).
    kp = _round_up(input_size, LANE)
    hp = _round_up(hidden, LANE)
    cp = _round_up(num_classes, LANE)

    # Batch tile: fill the MXU rows, but don't over-pad tiny batches.
    tm = min(_preferred_tm(), _round_up(batch, SUBLANE))
    bp = _round_up(batch, tm)
    grid = (bp // tm,)

    # Pad + cast operands (cheap XLA ops under jit).
    xp = _pad2d(x, bp, kp).astype(compute_dtype)
    w1p = _pad2d(w1, kp, hp).astype(compute_dtype)
    w2p = _pad2d(w2, hp, hp).astype(compute_dtype)
    w3p = _pad2d(w3, hp, cp).astype(compute_dtype)
    b1p = _pad2d(b1, 1, hp).astype(jnp.float32)
    b2p = _pad2d(b2, 1, hp).astype(jnp.float32)
    b3p = _pad2d(b3, 1, cp).astype(jnp.float32)

    # Explicit scoped-VMEM budget: double-buffered x/out tiles + resident
    # weights/biases + f32 intermediates, 2x headroom (16 MiB floor, 64 MiB cap
    # so it also fits v7x's 64 MiB VMEM per TC).
    bpe = jnp.dtype(compute_dtype).itemsize
    vmem_needed = (
        2 * tm * kp * bpe                        # double-buffered x tiles
        + 2 * tm * cp * 4                        # double-buffered out tiles (f32)
        + (kp * hp + hp * hp + hp * cp) * bpe    # resident weights
        + (2 * hp + cp) * 4                      # resident biases (f32)
        + 2 * tm * hp * 4                        # f32 intermediates
    )
    vmem_limit = int(min(max(2 * vmem_needed, 16 * 1024 * 1024),
                         64 * 1024 * 1024))

    const2d = lambda a: pl.BlockSpec(a.shape, lambda i: (0, 0))

    out_padded = pl.pallas_call(
        mlp_kernel,
        out_shape=jax.ShapeDtypeStruct((bp, cp), jnp.float32),
        grid=grid,
        in_specs=[
            pl.BlockSpec((tm, kp), lambda i: (i, 0)),   # x tiled over batch
            const2d(w1p), const2d(b1p),
            const2d(w2p), const2d(b2p),
            const2d(w3p), const2d(b3p),
        ],
        out_specs=pl.BlockSpec((tm, cp), lambda i: (i, 0)),
        compiler_params=pltpu.CompilerParams(
            dimension_semantics=("parallel",),   # v7x: shard batch tiles over 2 TCs
            vmem_limit_bytes=vmem_limit,
        ),
    )(xp, w1p, b1p, w2p, b2p, w3p, b3p)

    # Strip batch/class padding; return in the input dtype (f32).
    return out_padded[:batch, :num_classes].astype(x.dtype)


def init_params(key, input_size, hidden_size, num_classes):
    """Deterministic init mimicking nn.Linear's U(-1/sqrt(fan_in), 1/sqrt(fan_in)).

    Weights are [in_features, out_features] (transposed vs. PyTorch); biases
    are [1, out_features] for clean broadcasting.
    """
    ks = jax.random.split(key, 6)

    def linear(kw, kb, fan_in, fan_out):
        bound = 1.0 / jnp.sqrt(fan_in)
        w = jax.random.uniform(kw, (fan_in, fan_out), jnp.float32, -bound, bound)
        b = jax.random.uniform(kb, (1, fan_out), jnp.float32, -bound, bound)
        return w, b

    w1, b1 = linear(ks[0], ks[1], input_size, hidden_size)
    w2, b2 = linear(ks[2], ks[3], hidden_size, hidden_size)
    w3, b3 = linear(ks[4], ks[5], hidden_size, num_classes)
    return w1, b1, w2, b2, w3, b3


def _reference(x, params, dtype):
    """Same math as the kernel: operands cast to `dtype`, f32 accumulation."""
    w1, b1, w2, b2, w3, b3 = params
    h = jnp.dot(x.astype(dtype), w1.astype(dtype),
                preferred_element_type=jnp.float32) + b1
    h = jnp.maximum(h, 0.0)
    h = jnp.dot(h.astype(dtype), w2.astype(dtype),
                preferred_element_type=jnp.float32) + b2
    h = jnp.maximum(h, 0.0)
    return jnp.dot(h.astype(dtype), w3.astype(dtype),
                   preferred_element_type=jnp.float32) + b3


if __name__ == "__main__":
    input_size, hidden_size, num_classes = 32, 64, 16
    batch = 8

    key = jax.random.PRNGKey(0)
    kx, kparams = jax.random.split(key)
    x = jax.random.normal(kx, (batch, input_size), jnp.float32)
    params = init_params(kparams, input_size, hidden_size, num_classes)

    fwd = jax.jit(mlp_forward)
    out = jax.block_until_ready(fwd(x, *params))

    assert out.shape == (batch, num_classes)
    # Tight check vs. bf16-operand / f32-accumulate reference (kernel math).
    ref_bf16 = _reference(x, params, jnp.bfloat16)
    assert jnp.allclose(out, ref_bf16, atol=1e-3, rtol=1e-3), "bf16-ref mismatch"
    # Loose check vs. pure-f32 PyTorch-equivalent math (bf16 rounding only).
    ref_f32 = _reference(x, params, jnp.float32)
    assert jnp.allclose(out, ref_f32, atol=5e-2, rtol=5e-2), "f32-ref mismatch"

    print("KERNEL_OK")
</pallas_src>

<mosaic_0001>
module attributes {stable_mosaic.version = 11 : i64} {
  func.func @mlp_kernel(%arg0: i32, %arg1: memref<8x128xbf16, #tpu.memory_space<vmem>>, %arg2: memref<128x128xbf16, #tpu.memory_space<vmem>>, %arg3: memref<1x128xf32, #tpu.memory_space<vmem>>, %arg4: memref<128x128xbf16, #tpu.memory_space<vmem>>, %arg5: memref<1x128xf32, #tpu.memory_space<vmem>>, %arg6: memref<128x128xbf16, #tpu.memory_space<vmem>>, %arg7: memref<1x128xf32, #tpu.memory_space<vmem>>, %arg8: memref<8x128xf32, #tpu.memory_space<vmem>>) attributes {dimension_semantics = [#tpu.dimension_semantics<parallel>], iteration_bounds = array<i64: 1>, scalar_prefetch = 0 : i64, scratch_operands = 0 : i64, tpu.core_type = #tpu.core_type<tc>, window_params = [{transform_indices = @transform_0, window_bounds = array<i64: 8, 128>}, {pipeline_mode = #tpu.pipeline_mode<synchronous>, transform_indices = @transform_1, window_bounds = array<i64: 128, 128>}, {pipeline_mode = #tpu.pipeline_mode<synchronous>, transform_indices = @transform_2, window_bounds = array<i64: 1, 128>}, {pipeline_mode = #tpu.pipeline_mode<synchronous>, transform_indices = @transform_3, window_bounds = array<i64: 128, 128>}, {pipeline_mode = #tpu.pipeline_mode<synchronous>, transform_indices = @transform_4, window_bounds = array<i64: 1, 128>}, {pipeline_mode = #tpu.pipeline_mode<synchronous>, transform_indices = @transform_5, window_bounds = array<i64: 128, 128>}, {pipeline_mode = #tpu.pipeline_mode<synchronous>, transform_indices = @transform_6, window_bounds = array<i64: 1, 128>}, {transform_indices = @transform_7, window_bounds = array<i64: 8, 128>}]} {
    %c0 = arith.constant 0 : index
    %c0_0 = arith.constant 0 : index
    %0 = vector.load %arg1[%c0, %c0_0] : memref<8x128xbf16, #tpu.memory_space<vmem>>, vector<8x128xbf16>
    %c0_1 = arith.constant 0 : index
    %c0_2 = arith.constant 0 : index
    %1 = vector.load %arg2[%c0_1, %c0_2] : memref<128x128xbf16, #tpu.memory_space<vmem>>, vector<128x128xbf16>
    %cst = arith.constant dense<0.000000e+00> : vector<8x128xf32>
    %2 = tpu.matmul %0, %1, %cst {dimension_numbers = #tpu.dot_dimension_numbers<[1], [0], [0], [1], [0, 0, 1, 1], [], []>} : vector<8x128xbf16>, vector<128x128xbf16>, vector<8x128xf32> -> vector<8x128xf32>
    %c0_3 = arith.constant 0 : index
    %c0_4 = arith.constant 0 : index
    %3 = vector.load %arg3[%c0_3, %c0_4] : memref<1x128xf32, #tpu.memory_space<vmem>>, vector<1x128xf32>
    %4 = vector.broadcast %3 : vector<1x128xf32> to vector<8x128xf32>
    %5 = arith.addf %2, %4 : vector<8x128xf32>
    %cst_5 = arith.constant 0.000000e+00 : f32
    %6 = vector.broadcast %cst_5 : f32 to vector<8x128xf32>
    %7 = arith.maximumf %5, %6 : vector<8x128xf32>
    %8 = arith.truncf %7 : vector<8x128xf32> to vector<8x128xbf16>
    %c0_6 = arith.constant 0 : index
    %c0_7 = arith.constant 0 : index
    %9 = vector.load %arg4[%c0_6, %c0_7] : memref<128x128xbf16, #tpu.memory_space<vmem>>, vector<128x128xbf16>
    %cst_8 = arith.constant dense<0.000000e+00> : vector<8x128xf32>
    %10 = tpu.matmul %8, %9, %cst_8 {dimension_numbers = #tpu.dot_dimension_numbers<[1], [0], [0], [1], [0, 0, 1, 1], [], []>} : vector<8x128xbf16>, vector<128x128xbf16>, vector<8x128xf32> -> vector<8x128xf32>
    %c0_9 = arith.constant 0 : index
    %c0_10 = arith.constant 0 : index
    %11 = vector.load %arg5[%c0_9, %c0_10] : memref<1x128xf32, #tpu.memory_space<vmem>>, vector<1x128xf32>
    %12 = vector.broadcast %11 : vector<1x128xf32> to vector<8x128xf32>
    %13 = arith.addf %10, %12 : vector<8x128xf32>
    %cst_11 = arith.constant 0.000000e+00 : f32
    %14 = vector.broadcast %cst_11 : f32 to vector<8x128xf32>
    %15 = arith.maximumf %13, %14 : vector<8x128xf32>
    %16 = arith.truncf %15 : vector<8x128xf32> to vector<8x128xbf16>
    %c0_12 = arith.constant 0 : index
    %c0_13 = arith.constant 0 : index
    %17 = vector.load %arg6[%c0_12, %c0_13] : memref<128x128xbf16, #tpu.memory_space<vmem>>, vector<128x128xbf16>
    %cst_14 = arith.constant dense<0.000000e+00> : vector<8x128xf32>
    %18 = tpu.matmul %16, %17, %cst_14 {dimension_numbers = #tpu.dot_dimension_numbers<[1], [0], [0], [1], [0, 0, 1, 1], [], []>} : vector<8x128xbf16>, vector<128x128xbf16>, vector<8x128xf32> -> vector<8x128xf32>
    %c0_15 = arith.constant 0 : index
    %c0_16 = arith.constant 0 : index
    %19 = vector.load %arg7[%c0_15, %c0_16] : memref<1x128xf32, #tpu.memory_space<vmem>>, vector<1x128xf32>
    %20 = vector.broadcast %19 : vector<1x128xf32> to vector<8x128xf32>
    %21 = arith.addf %18, %20 : vector<8x128xf32>
    %c0_17 = arith.constant 0 : index
    %c0_18 = arith.constant 0 : index
    %22 = vector.load %arg8[%c0_17, %c0_18] : memref<8x128xf32, #tpu.memory_space<vmem>>, vector<8x128xf32>
    tpu.vector_store %arg8[%c0_17, %c0_18], %21 {strides = array<i32>} : memref<8x128xf32, #tpu.memory_space<vmem>>, vector<8x128xf32>,
    return
  }
  func.func @transform_0(%arg0: i32) -> (i32, i32) {
    %c0_i32 = arith.constant 0 : i32
    %c0_i32_0 = arith.constant 0 : i32
    return %arg0, %c0_i32 : i32, i32
  }
  func.func @transform_1(%arg0: i32) -> (i32, i32) {
    %c0_i32 = arith.constant 0 : i32
    %c0_i32_0 = arith.constant 0 : i32
    %c0_i32_1 = arith.constant 0 : i32
    return %c0_i32, %c0_i32_0 : i32, i32
  }
  func.func @transform_2(%arg0: i32) -> (i32, i32) {
    %c0_i32 = arith.constant 0 : i32
    %c0_i32_0 = arith.constant 0 : i32
    %c0_i32_1 = arith.constant 0 : i32
    return %c0_i32, %c0_i32_0 : i32, i32
  }
  func.func @transform_3(%arg0: i32) -> (i32, i32) {
    %c0_i32 = arith.constant 0 : i32
    %c0_i32_0 = arith.constant 0 : i32
    %c0_i32_1 = arith.constant 0 : i32
    return %c0_i32, %c0_i32_0 : i32, i32
  }
  func.func @transform_4(%arg0: i32) -> (i32, i32) {
    %c0_i32 = arith.constant 0 : i32
    %c0_i32_0 = arith.constant 0 : i32
    %c0_i32_1 = arith.constant 0 : i32
    return %c0_i32, %c0_i32_0 : i32, i32
  }
  func.func @transform_5(%arg0: i32) -> (i32, i32) {
    %c0_i32 = arith.constant 0 : i32
    %c0_i32_0 = arith.constant 0 : i32
    %c0_i32_1 = arith.constant 0 : i32
    return %c0_i32, %c0_i32_0 : i32, i32
  }
  func.func @transform_6(%arg0: i32) -> (i32, i32) {
    %c0_i32 = arith.constant 0 : i32
    %c0_i32_0 = arith.constant 0 : i32
    %c0_i32_1 = arith.constant 0 : i32
    return %c0_i32, %c0_i32_0 : i32, i32
  }
  func.func @transform_7(%arg0: i32) -> (i32, i32) {
    %c0_i32 = arith.constant 0 : i32
    %c0_i32_0 = arith.constant 0 : i32
    return %arg0, %c0_i32 : i32, i32
  }
}

</mosaic_0001>

<bundles_post_ra>
// kernel: mlp_forward.1
= control target key start
LH: loop header
LB: loop body
LE: loop exit
PB: predicated region body
PF: predicated region fallthrough
CT: control target
= control target key end

     0   :  { %s570_s0 = inlined_call_operand.vmem [shape: bf16[8,128], index: 0, kind: input, shape index: {}]   ;;  %s571_s1 = inlined_call_operand.vmem [shape: bf16[128,128], index: 1, kind: input, shape index: {}]   ;;  %s572_s2 = inlined_call_operand.vmem [shape: f32[1,128], index: 2, kind: input, shape index: {}]   ;;  %s573_s3 = inlined_call_operand.vmem [shape: bf16[128,128], index: 3, kind: input, shape index: {}]   ;;  %s574_s4 = inlined_call_operand.vmem [shape: f32[1,128], index: 4, kind: input, shape index: {}]   ;;  %s575_s5 = inlined_call_operand.vmem [shape: bf16[128,128], index: 5, kind: input, shape index: {}]   ;;  %s576_s6 = inlined_call_operand.vmem [shape: f32[1,128], index: 6, kind: input, shape index: {}]   ;;  %s577_s7 = inlined_call_operand.hbm [shape: f32[8,128], index: 7, kind: output, shape index: {}]  }
   0x1   :  { %v395_v0 = vld [vmem:[%s571_s1 + $0x38] sm:$0xff]  ;;  %v394_v1 = vld [vmem:[%s571_s1 + $0x30] sm:$0xff]  ;;  %v393_v4 = vld [vmem:[%s571_s1 + $0x28] sm:$0xff] }
   0x2   :  { %96 = vmatpush.bf16.msra.mxu0 %v395_v0  ;;  %v403_v2 = vld [vmem:[%s573_s3 + $0x38] sm:$0xff]  ;;  %v402_v3 = vld [vmem:[%s573_s3 + $0x30] sm:$0xff] }
   0x3   :  { %179 = vmatpush.bf16.msra.mxu1 %v403_v2 }
   0x6   :  { %97 = vmatpush.bf16.msra.mxu0 %v394_v1 }
   0x7   :  { %12 = vsyncpa [#allocation3], 0  ;;  %180 = vmatpush.bf16.msra.mxu1 %v402_v3  ;;  %v401_v5 = vld [vmem:[%s573_s3 + $0x28] sm:$0xff]  ;;  %v392_v6 = vld [vmem:[%s571_s1 + $0x20] sm:$0xff]  ;;  %s442_s30 = smov [#allocation2]  }
   0x8   :  { %v400_v7 = vld [vmem:[%s573_s3 + $0x20] sm:$0xff]  ;;  %v391_v8 = vld [vmem:[%s571_s1 + $0x18] sm:$0xff]  ;;  %v390_v10 = vld [vmem:[%s571_s1 + $0x10] sm:$0xff]  ;;  %s281_s8 = sshll.u32 %s442_s30, 4  ;;  %s282_s8 = int_to_ptr.vmem [resolvable:$true] %s281_s8 }
   0x9   :  { %v399_v9 = vld [vmem:[%s573_s3 + $0x18] sm:$0xff]  ;;  %v398_v11 = vld [vmem:[%s573_s3 + $0x10] sm:$0xff]  ;;  %v389_v12 = vld [vmem:[%s571_s1 + $0x8] sm:$0xff] }
   0xa   :  { %98 = vmatpush.bf16.msra.mxu0 %v393_v4  ;;  %v388_v13 = vld [vmem:[%s571_s1] sm:$0xff]  ;;  %v397_v15 = vld [vmem:[%s573_s3 + $0x8] sm:$0xff]  ;;  %v411_v17 = vld [vmem:[%s575_s5 + $0x38] sm:$0xff] }
   0xb   :  { %181 = vmatpush.bf16.msra.mxu1 %v401_v5  ;;  %v27_v14 = vld [vmem:[%s570_s0] sm:$0xf]  ;;  %262 = vmatpush.bf16.msra.mxu2 %v411_v17  ;;  %v410_v18 = vld [vmem:[%s575_s5 + $0x30] sm:$0xff]  ;;  %v409_v19 = vld [vmem:[%s575_s5 + $0x28] sm:$0xff] }
   0xc   :  { %v396_v16 = vld [vmem:[%s573_s3] sm:$0xff]  ;;  %v407_v21 = vld [vmem:[%s575_s5 + $0x18] sm:$0xff]  ;;  %v406_v22 = vld [vmem:[%s575_s5 + $0x10] sm:$0xff] }
   0xd   :  { %v408_v20 = vld [vmem:[%s575_s5 + $0x20] sm:$0xff]  ;;  %v405_v29 = vld [vmem:[%s575_s5 + $0x8] sm:$0xff] }
   0xe   :  { %99 = vmatpush.bf16.msra.mxu0 %v392_v6  ;;  %v413_v23 = vld [vmem:[%s572_s2] ss:$0 sm:$0xff] }
   0xf   :  { %182 = vmatpush.bf16.msra.mxu1 %v400_v7  ;;  %263 = vmatpush.bf16.msra.mxu2 %v410_v18  ;;  %v404_v30 = vld [vmem:[%s575_s5] sm:$0xff]  ;;  %s283_s5 = sshll.u32 %s577_s7, 4  ;;  %s284_s5 = int_to_ptr.hbm [resolvable:$true] %s283_s5 }
  0x10   :  { %v414_v31 = vld [vmem:[%s574_s4] ss:$0 sm:$0xff] }
  0x11   :  { %v415_v37 = vld [vmem:[%s576_s6] ss:$0 sm:$0xff] }
  0x12   :  { %100 = vmatpush.bf16.msra.mxu0 %v391_v8 }
  0x13   :  { %183 = vmatpush.bf16.msra.mxu1 %v399_v9  ;;  %264 = vmatpush.bf16.msra.mxu2 %v409_v19 }
  0x16   :  { %101 = vmatpush.bf16.msra.mxu0 %v390_v10 }
  0x17   :  { %184 = vmatpush.bf16.msra.mxu1 %v398_v11  ;;  %265 = vmatpush.bf16.msra.mxu2 %v408_v20 }
  0x1a   :  { %102 = vmatpush.bf16.msra.mxu0 %v389_v12 }
  0x1b   :  { %185 = vmatpush.bf16.msra.mxu1 %v397_v15  ;;  %266 = vmatpush.bf16.msra.mxu2 %v407_v21 }
  0x1e   :  { %103 = vmatpush.bf16.msra.mxu0 %v388_v13 }
  0x1f   :  { %186 = vmatpush.bf16.msra.mxu1 %v396_v16  ;;  %267 = vmatpush.bf16.msra.mxu2 %v406_v22 }
  0x21   :  { %104 = vmatmul.bf16.vlgmr.msra.gmra.mxu0 %v27_v14 }
  0x23   :  { %268 = vmatpush.bf16.msra.mxu2 %v405_v29 }
  0x27   :  { %269 = vmatpush.bf16.msra.mxu2 %v404_v30 }
  0x9e   :  { %v105_v24 = vpop.f32.mrf.mxu0 }
  0x9f   :  { %v106_v25 = vadd.f32 %v413_v23, %v105_v24 }
  0xa1   :  { %v109_v26 = vmax.f32 %v106_v25, 0.0 }
  0xa3   :  { %v110_v27 = vpack.c.bf16 %v109_v26, %v109_v26 }
  0xa5   :  { %187 = vmatmul.bf16.vlgmr.msra.gmra.mxu1 %v110_v27 }
  0xa6   :  { %v107_v28 = vpop.f32.mrf.mxu0 }
 0x122   :  { %v188_v32 = vpop.f32.mrf.mxu1 }
 0x123   :  { %v189_v33 = vadd.f32 %v414_v31, %v188_v32 }
 0x125   :  { %v192_v34 = vmax.f32 %v189_v33, 0.0 }
 0x127   :  { %v193_v35 = vpack.c.bf16 %v192_v34, %v192_v34 }
 0x129   :  { %270 = vmatmul.bf16.vlgmr.msra.gmra.mxu2 %v193_v35 }
 0x12a   :  { %v190_v36 = vpop.f32.mrf.mxu1 }
 0x1ac   :  { %v271_v38 = vpop.f32.mrf.mxu2 }
 0x1ad   :  { %v272_v39 = vadd.f32 %v415_v37, %v271_v38 }
 0x1af   :  { %275 = vst [vmem:[#allocation2] sm:$0xff] %v272_v39 }
 0x1b0   :  { %286 = dma.vmem_to_hbm [thread:$0]  %s282_s8, 128, %s284_s5, [#allocation3]  }
 0x1b4   :  { %v273_v40 = vpop.f32.mrf.mxu2 }
 0x1b5   :  { %440 = dma.done.wait [#allocation3], 128  }
 0x1b6   :  { %441 = vsyncadd [#allocation3], 4294967168 }
 0x1b7   :  { %291 = vsyncpa [#allocation3], 1 }

</bundles_post_ra>
